<compile_context>
chip_gen: v5e
topology: v5e:2x2
jax: 0.10.0
libtpu: 0.0.40
codegen_flags: <defaults>
</compile_context>

<pallas_src>
import functools
import math

import jax
import jax.numpy as jnp
from jax import lax
from jax.experimental import pallas as pl
from jax.experimental.pallas import tpu as pltpu


# ----------------------------------------------------------------------------
# Tiling helpers
# ----------------------------------------------------------------------------
def _round_up(v, m):
    return ((v + m - 1) // m) * m


def _pick_m_tile(m, cap=256):
    """Row tile: multiple of 8 (or the full extent), capped, and split so the
    parallel M grid axis has >= 2 steps when possible (keeps both v7x
    TensorCores busy)."""
    if m <= 8:
        return m
    tm = min(cap, m)
    if tm == m:                       # single grid step -> try to split in two
        half = _round_up((m + 1) // 2, 8)
        if half < m:
            tm = half
    return tm


def _pick_k_tile(k):
    if k <= 1024:
        return k                      # full K in one block (no reduction axis)
    for cand in (1024, 512, 256, 128):
        if k % cand == 0:
            return cand
    return k                          # TODO(synk): pad path for odd large K


def _layernorm_rows(x_f32, alpha_f32, bias_f32, eps):
    """Norm as in the PyTorch module: (x - mean) / (std_unbiased + eps).
    Two-pass (center first) to avoid catastrophic cancellation."""
    d = x_f32.shape[-1]
    mean = jnp.sum(x_f32, axis=-1, keepdims=True) * jnp.float32(1.0 / d)
    xc = x_f32 - mean
    ddof = max(d - 1, 1)
    var = jnp.sum(xc * xc, axis=-1, keepdims=True) * jnp.float32(1.0 / ddof)
    std = jnp.sqrt(jnp.maximum(var, jnp.float32(0.0)))
    inv = pl.reciprocal(std + jnp.float32(eps), approx=False)
    return xc * inv * alpha_f32 + bias_f32


# ----------------------------------------------------------------------------
# Kernel 1: fused Norm + Linear      y = norm(x) @ W + b
# ----------------------------------------------------------------------------
def _norm_linear_kernel(x_ref, alpha_ref, bias_ref, w_ref, b_ref, o_ref, *, eps):
    x = x_ref[...].astype(jnp.float32)                       # (tm, D) full row
    xn = _layernorm_rows(x, alpha_ref[...].astype(jnp.float32),
                         bias_ref[...].astype(jnp.float32), eps)
    y = jnp.dot(xn.astype(w_ref.dtype), w_ref[...],
                preferred_element_type=jnp.float32)
    y = y + b_ref[...].astype(jnp.float32)
    o_ref[...] = y.astype(o_ref.dtype)


def fused_norm_linear(x2d, alpha, bias, w, b, eps):
    """x2d: [M, D]; alpha/bias: [D]; w: [D, N]; b: [N]."""
    m, d = x2d.shape
    n = w.shape[1]
    tm = _pick_m_tile(m)
    tn = n if n <= 512 else 512
    grid = (pl.cdiv(m, tm), pl.cdiv(n, tn))

    return pl.pallas_call(
        functools.partial(_norm_linear_kernel, eps=eps),
        out_shape=jax.ShapeDtypeStruct((m, n), x2d.dtype),
        grid_spec=pltpu.PrefetchScalarGridSpec(
            num_scalar_prefetch=0,
            grid=grid,
            in_specs=[
                pl.BlockSpec((tm, d), lambda i, j: (i, 0)),
                pl.BlockSpec((1, d), lambda i, j: (0, 0)),
                pl.BlockSpec((1, d), lambda i, j: (0, 0)),
                pl.BlockSpec((d, tn), lambda i, j: (0, j)),
                pl.BlockSpec((1, tn), lambda i, j: (0, j)),
            ],
            out_specs=pl.BlockSpec((tm, tn), lambda i, j: (i, j)),
        ),
        compiler_params=pltpu.CompilerParams(
            dimension_semantics=("parallel", "parallel")),
    )(x2d, alpha.reshape(1, d), bias.reshape(1, d), w, b.reshape(1, n))


# ----------------------------------------------------------------------------
# Kernel 2: plain Linear (K-tiled accumulator, optional fused residual add)
# ----------------------------------------------------------------------------
def _make_linear_kernel(has_residual):
    def kernel(*refs):
        if has_residual:
            x_ref, w_ref, b_ref, r_ref, o_ref, acc_ref = refs
        else:
            x_ref, w_ref, b_ref, o_ref, acc_ref = refs
            r_ref = None
        kk = pl.program_id(2)

        @pl.when(kk == 0)
        def _():
            acc_ref[...] = jnp.zeros_like(acc_ref)

        acc_ref[...] += jnp.dot(x_ref[...], w_ref[...],
                                preferred_element_type=jnp.float32)

        @pl.when(kk == pl.num_programs(2) - 1)
        def _():
            y = acc_ref[...] + b_ref[...].astype(jnp.float32)
            if has_residual:
                y = y + r_ref[...].astype(jnp.float32)
            o_ref[...] = y.astype(o_ref.dtype)

    return kernel


def linear_pallas(x, w, b, *, residual=None):
    """x: [M, K]; w: [K, N]; b: [N]; residual: optional [M, N]."""
    m, k = x.shape
    n = w.shape[1]
    tm = _pick_m_tile(m)
    tn = n if n <= 512 else 512
    tk = _pick_k_tile(k)
    grid = (pl.cdiv(m, tm), pl.cdiv(n, tn), pl.cdiv(k, tk))

    in_specs = [
        pl.BlockSpec((tm, tk), lambda i, j, kk: (i, kk)),
        pl.BlockSpec((tk, tn), lambda i, j, kk: (kk, j)),
        pl.BlockSpec((1, tn), lambda i, j, kk: (0, j)),
    ]
    args = [x, w, b.reshape(1, n)]
    if residual is not None:
        in_specs.append(pl.BlockSpec((tm, tn), lambda i, j, kk: (i, j)))
        args.append(residual)

    return pl.pallas_call(
        _make_linear_kernel(has_residual=residual is not None),
        out_shape=jax.ShapeDtypeStruct((m, n), x.dtype),
        grid_spec=pltpu.PrefetchScalarGridSpec(
            num_scalar_prefetch=0,
            grid=grid,
            in_specs=in_specs,
            out_specs=pl.BlockSpec((tm, tn), lambda i, j, kk: (i, j)),
            scratch_shapes=[pltpu.VMEM((tm, tn), jnp.float32)],
        ),
        compiler_params=pltpu.CompilerParams(
            dimension_semantics=("parallel", "parallel", "arbitrary")),
    )(*args)


# ----------------------------------------------------------------------------
# Kernel 3: attention core, all heads per grid step, concat-layout output
# ----------------------------------------------------------------------------
def _make_attn_kernel(heads, scale, has_mask):
    def kernel(*refs):
        if has_mask:
            q_ref, k_ref, v_ref, m_ref, o_ref = refs
        else:
            q_ref, k_ref, v_ref, o_ref = refs
        q = q_ref[...]                                    # (Sq, D)
        q = q * jnp.asarray(scale, q.dtype)               # fold 1/sqrt(dk) into q
        k = k_ref[...]                                    # (Sk, D)
        v = v_ref[...]                                    # (Sk, D)
        d = q.shape[-1]
        dk = d // heads
        if has_mask:
            masked = (m_ref[...] == 0)                    # (Sq, Sk)

        outs = []
        for h in range(heads):
            sl = slice(h * dk, (h + 1) * dk)
            # contract last dims directly -> no k.T relayout
            s = lax.dot_general(q[:, sl], k[:, sl],
                                (((1,), (1,)), ((), ())),
                                preferred_element_type=jnp.float32)
            if has_mask:
                s = jnp.where(masked, jnp.float32(-1e9), s)
            s_max = jnp.max(s, axis=-1, keepdims=True)
            p = jnp.exp(s - s_max)
            denom = jnp.sum(p, axis=-1, keepdims=True)
            # TODO(synk): attention-dropout on p omitted (eval-mode identity).
            o = jnp.dot(p.astype(v.dtype), v[:, sl],
                        preferred_element_type=jnp.float32)
            o = o * pl.reciprocal(denom, approx=True)     # EUP slot, ~free
            outs.append(o)
        o_ref[...] = jnp.concatenate(outs, axis=-1).astype(o_ref.dtype)

    return kernel


def _col_spec(block_shape, col):
    return pl.BlockSpec(block_shape, lambda b: (b, 0, col))


def attention_core_pallas(q_arr, kv_arr, heads, scale, mask,
                          q_col, k_col, v_col, d_model):
    """q_arr: [B, Sq, *]; kv_arr: [B, Sk, *].  q/k/v are D-wide column blocks
    (q_col/k_col/v_col) of those arrays.  Output: [B, Sq, D] concat layout."""
    B, Sq = q_arr.shape[0], q_arr.shape[1]
    Sk = kv_arr.shape[1]
    D = d_model
    has_mask = mask is not None
    if has_mask and mask.shape[1] != Sq:
        mask = jnp.broadcast_to(mask, (B, Sq, Sk))

    in_specs = [
        _col_spec((None, Sq, D), q_col),
        _col_spec((None, Sk, D), k_col),
        _col_spec((None, Sk, D), v_col),
    ]
    args = [q_arr, kv_arr, kv_arr]
    if has_mask:
        in_specs.append(pl.BlockSpec((None, Sq, Sk), lambda b: (b, 0, 0)))
        args.append(mask)

    return pl.pallas_call(
        _make_attn_kernel(heads=heads, scale=scale, has_mask=has_mask),
        out_shape=jax.ShapeDtypeStruct((B, Sq, D), q_arr.dtype),
        grid_spec=pltpu.PrefetchScalarGridSpec(
            num_scalar_prefetch=0,
            grid=(B,),
            in_specs=in_specs,
            out_specs=pl.BlockSpec((None, Sq, D), lambda b: (b, 0, 0)),
        ),
        compiler_params=pltpu.CompilerParams(dimension_semantics=("parallel",)),
    )(*args)


# ----------------------------------------------------------------------------
# Kernel 4: fused Norm + FeedForward + residual
#   out = relu(norm(x) @ w1 + b1) @ w2 + b2 + residual
# ----------------------------------------------------------------------------
def _norm_ffn_kernel(x_ref, alpha_ref, bias_ref, w1_ref, b1_ref,
                     w2_ref, b2_ref, r_ref, o_ref, *, eps):
    x = x_ref[...].astype(jnp.float32)
    xn = _layernorm_rows(x, alpha_ref[...].astype(jnp.float32),
                         bias_ref[...].astype(jnp.float32), eps)
    h = jnp.dot(xn.astype(w1_ref.dtype), w1_ref[...],
                preferred_element_type=jnp.float32)
    h = jnp.maximum(h + b1_ref[...].astype(jnp.float32), jnp.float32(0.0))
    # TODO(synk): FeedForward dropout omitted (eval-mode identity).
    y = jnp.dot(h.astype(w2_ref.dtype), w2_ref[...],
                preferred_element_type=jnp.float32)
    y = y + b2_ref[...].astype(jnp.float32) + r_ref[...].astype(jnp.float32)
    o_ref[...] = y.astype(o_ref.dtype)


def fused_norm_ffn(x2d, alpha, bias, w1, b1, w2, b2, residual, eps):
    m, d = x2d.shape
    f = w1.shape[1]
    tm = _pick_m_tile(m)
    grid = (pl.cdiv(m, tm),)
    # TODO(synk): for d_ff too large for VMEM, tile the d_ff axis (emit_pipeline).
    return pl.pallas_call(
        functools.partial(_norm_ffn_kernel, eps=eps),
        out_shape=jax.ShapeDtypeStruct((m, d), x2d.dtype),
        grid_spec=pltpu.PrefetchScalarGridSpec(
            num_scalar_prefetch=0,
            grid=grid,
            in_specs=[
                pl.BlockSpec((tm, d), lambda i: (i, 0)),
                pl.BlockSpec((1, d), lambda i: (0, 0)),
                pl.BlockSpec((1, d), lambda i: (0, 0)),
                pl.BlockSpec((d, f), lambda i: (0, 0)),
                pl.BlockSpec((1, f), lambda i: (0, 0)),
                pl.BlockSpec((f, d), lambda i: (0, 0)),
                pl.BlockSpec((1, d), lambda i: (0, 0)),
                pl.BlockSpec((tm, d), lambda i: (i, 0)),
            ],
            out_specs=pl.BlockSpec((tm, d), lambda i: (i, 0)),
        ),
        compiler_params=pltpu.CompilerParams(dimension_semantics=("parallel",)),
    )(x2d, alpha.reshape(1, d), bias.reshape(1, d),
      w1, b1.reshape(1, f), w2, b2.reshape(1, d), residual)


# ----------------------------------------------------------------------------
# DecoderLayer forward (8 pallas_calls per layer)
# ----------------------------------------------------------------------------
def decoder_layer_pallas(x, e_outputs, params, heads,
                         src_mask=None, trg_mask=None, eps=1e-6):
    # TODO(synk): dropout_1/2/3 treated as identity (eval-mode forward).
    B, Sq, D = x.shape
    Sk = e_outputs.shape[1]
    dk = D // heads
    scale = 1.0 / math.sqrt(dk)

    xf = x.reshape(-1, D)
    ef = e_outputs.reshape(-1, D)

    # ---- self-attention: norm1 fused into one QKV projection ----
    p1 = params["attn1"]
    w_qkv = jnp.concatenate([p1["wq"], p1["wk"], p1["wv"]], axis=1)   # [D, 3D]
    b_qkv = jnp.concatenate([p1["bq"], p1["bk"], p1["bv"]])
    qkv = fused_norm_linear(xf, params["norm1"]["alpha"], params["norm1"]["bias"],
                            w_qkv, b_qkv, eps).reshape(B, Sq, 3 * D)
    ctx = attention_core_pallas(qkv, qkv, heads, scale, trg_mask,
                                q_col=0, k_col=1, v_col=2, d_model=D)
    xf = linear_pallas(ctx.reshape(-1, D), p1["wo"], p1["bo"], residual=xf)

    # ---- cross-attention: norm2 fused into Q projection; K|V fused proj ----
    p2 = params["attn2"]
    q2 = fused_norm_linear(xf, params["norm2"]["alpha"], params["norm2"]["bias"],
                           p2["wq"], p2["bq"], eps).reshape(B, Sq, D)
    w_kv = jnp.concatenate([p2["wk"], p2["wv"]], axis=1)              # [D, 2D]
    b_kv = jnp.concatenate([p2["bk"], p2["bv"]])
    kv = linear_pallas(ef, w_kv, b_kv).reshape(B, Sk, 2 * D)
    ctx = attention_core_pallas(q2, kv, heads, scale, src_mask,
                                q_col=0, k_col=0, v_col=1, d_model=D)
    xf = linear_pallas(ctx.reshape(-1, D), p2["wo"], p2["bo"], residual=xf)

    # ---- feed-forward: norm3 + FFN + residual fully fused ----
    pf = params["ff"]
    xf = fused_norm_ffn(xf, params["norm3"]["alpha"], params["norm3"]["bias"],
                        pf["w1"], pf["b1"], pf["w2"], pf["b2"],
                        residual=xf, eps=eps)
    return xf.reshape(B, Sq, D)


# ----------------------------------------------------------------------------
# Pure-JAX reference (mirrors the PyTorch forward in eval mode)
# ----------------------------------------------------------------------------
def norm_ref(x, alpha, bias, eps):
    x32 = x.astype(jnp.float32)
    mean = jnp.mean(x32, axis=-1, keepdims=True)
    std = jnp.std(x32, axis=-1, keepdims=True, ddof=1)
    return (alpha * (x32 - mean) / (std + eps) + bias).astype(x.dtype)


def mha_ref(q, k, v, p, heads, mask):
    B, Sq, D = q.shape
    Sk = k.shape[1]
    dk = D // heads
    qh = (q @ p["wq"] + p["bq"]).reshape(B, Sq, heads, dk).transpose(0, 2, 1, 3)
    kh = (k @ p["wk"] + p["bk"]).reshape(B, Sk, heads, dk).transpose(0, 2, 1, 3)
    vh = (v @ p["wv"] + p["bv"]).reshape(B, Sk, heads, dk).transpose(0, 2, 1, 3)
    s = jnp.einsum("bhqd,bhkd->bhqk", qh, kh) / math.sqrt(dk)
    if mask is not None:
        s = jnp.where(mask[:, None, :, :] == 0, -1e9, s)
    a = jax.nn.softmax(s, axis=-1)
    ctx = jnp.einsum("bhqk,bhkd->bhqd", a, vh)
    concat = ctx.transpose(0, 2, 1, 3).reshape(B, Sq, D)
    return concat @ p["wo"] + p["bo"]


def ff_ref(x, p):
    return jax.nn.relu(x @ p["w1"] + p["b1"]) @ p["w2"] + p["b2"]


def decoder_layer_ref(x, e, params, heads, src_mask, trg_mask, eps):
    x2 = norm_ref(x, params["norm1"]["alpha"], params["norm1"]["bias"], eps)
    x = x + mha_ref(x2, x2, x2, params["attn1"], heads, trg_mask)
    x2 = norm_ref(x, params["norm2"]["alpha"], params["norm2"]["bias"], eps)
    x = x + mha_ref(x2, e, e, params["attn2"], heads, src_mask)
    x2 = norm_ref(x, params["norm3"]["alpha"], params["norm3"]["bias"], eps)
    x = x + ff_ref(x2, params["ff"])
    return x


# ----------------------------------------------------------------------------
if __name__ == "__main__":
    key = jax.random.PRNGKey(0)
    batch, seq, d_model, heads, d_ff = 2, 8, 128, 4, 256
    eps = 1e-6

    keys = jax.random.split(key, 10)

    def w(k, shape, scale=0.05):
        return scale * jax.random.normal(k, shape, dtype=jnp.float32)

    def attn_params(k):
        ks = jax.random.split(k, 8)
        return dict(
            wq=w(ks[0], (d_model, d_model)), bq=w(ks[1], (d_model,)),
            wk=w(ks[2], (d_model, d_model)), bk=w(ks[3], (d_model,)),
            wv=w(ks[4], (d_model, d_model)), bv=w(ks[5], (d_model,)),
            wo=w(ks[6], (d_model, d_model)), bo=w(ks[7], (d_model,)),
        )

    ones = jnp.ones((d_model,), jnp.float32)
    zeros = jnp.zeros((d_model,), jnp.float32)
    params = dict(
        norm1=dict(alpha=ones, bias=zeros),
        norm2=dict(alpha=ones, bias=zeros),
        norm3=dict(alpha=ones, bias=zeros),
        attn1=attn_params(keys[0]),
        attn2=attn_params(keys[1]),
        ff=dict(w1=w(keys[2], (d_model, d_ff)), b1=w(keys[3], (d_ff,)),
                w2=w(keys[4], (d_ff, d_model)), b2=w(keys[5], (d_model,))),
    )

    x = jax.random.normal(keys[6], (batch, seq, d_model), dtype=jnp.float32)
    e_outputs = jax.random.normal(keys[7], (batch, seq, d_model), dtype=jnp.float32)
    trg_mask = jnp.tile(jnp.tril(jnp.ones((seq, seq), jnp.float32))[None],
                        (batch, 1, 1))
    src_mask = None

    out = decoder_layer_pallas(x, e_outputs, params, heads,
                               src_mask=src_mask, trg_mask=trg_mask, eps=eps)
    out = jax.block_until_ready(out)

    ref = decoder_layer_ref(x, e_outputs, params, heads, src_mask, trg_mask, eps)
    assert out.shape == x.shape
    err = float(jnp.max(jnp.abs(out - ref)))
    # tolerance slightly relaxed vs 1e-4: softmax denom uses the EUP approx
    # reciprocal (per perf review); everything else is exact f32 math.
    assert jnp.allclose(out, ref, atol=2e-3, rtol=2e-3), \
        f"mismatch vs reference: {err}"

    print("KERNEL_OK")
</pallas_src>

<mosaic_0001>
module attributes {stable_mosaic.version = 11 : i64} {
  func.func @_norm_linear_kernel(%arg0: i32, %arg1: i32, %arg2: memref<8x128xf32, #tpu.memory_space<vmem>>, %arg3: memref<1x128xf32, #tpu.memory_space<vmem>>, %arg4: memref<1x128xf32, #tpu.memory_space<vmem>>, %arg5: memref<128x384xf32, #tpu.memory_space<vmem>>, %arg6: memref<1x384xf32, #tpu.memory_space<vmem>>, %arg7: memref<8x384xf32, #tpu.memory_space<vmem>>) attributes {dimension_semantics = [#tpu.dimension_semantics<parallel>, #tpu.dimension_semantics<parallel>], iteration_bounds = array<i64: 2, 1>, scalar_prefetch = 0 : i64, scratch_operands = 0 : i64, tpu.core_type = #tpu.core_type<tc>, window_params = [{transform_indices = @transform_0, window_bounds = array<i64: 8, 128>}, {pipeline_mode = #tpu.pipeline_mode<synchronous>, transform_indices = @transform_1, window_bounds = array<i64: 1, 128>}, {pipeline_mode = #tpu.pipeline_mode<synchronous>, transform_indices = @transform_2, window_bounds = array<i64: 1, 128>}, {transform_indices = @transform_3, window_bounds = array<i64: 128, 384>}, {transform_indices = @transform_4, window_bounds = array<i64: 1, 384>}, {transform_indices = @transform_5, window_bounds = array<i64: 8, 384>}]} {
    %c0 = arith.constant 0 : index
    %c0_0 = arith.constant 0 : index
    %0 = vector.load %arg2[%c0, %c0_0] : memref<8x128xf32, #tpu.memory_space<vmem>>, vector<8x128xf32>
    %c0_1 = arith.constant 0 : index
    %c0_2 = arith.constant 0 : index
    %1 = vector.load %arg3[%c0_1, %c0_2] : memref<1x128xf32, #tpu.memory_space<vmem>>, vector<1x128xf32>
    %c0_3 = arith.constant 0 : index
    %c0_4 = arith.constant 0 : index
    %2 = vector.load %arg4[%c0_3, %c0_4] : memref<1x128xf32, #tpu.memory_space<vmem>>, vector<1x128xf32>
    %cst = arith.constant dense<0.000000e+00> : vector<8xf32>
    %3 = vector.multi_reduction <add>, %0, %cst [1] : vector<8x128xf32> to vector<8xf32>
    %4 = vector.shape_cast %3 : vector<8xf32> to vector<8x1xf32>
    %cst_5 = arith.constant 7.812500e-03 : f32
    %5 = vector.broadcast %cst_5 : f32 to vector<8x1xf32>
    %6 = arith.mulf %4, %5 : vector<8x1xf32>
    %7 = vector.broadcast %6 : vector<8x1xf32> to vector<8x128xf32>
    %8 = arith.subf %0, %7 : vector<8x128xf32>
    %9 = arith.mulf %8, %8 : vector<8x128xf32>
    %cst_6 = arith.constant dense<0.000000e+00> : vector<8xf32>
    %10 = vector.multi_reduction <add>, %9, %cst_6 [1] : vector<8x128xf32> to vector<8xf32>
    %11 = vector.shape_cast %10 : vector<8xf32> to vector<8x1xf32>
    %cst_7 = arith.constant 0.00787401571 : f32
    %12 = vector.broadcast %cst_7 : f32 to vector<8x1xf32>
    %13 = arith.mulf %11, %12 : vector<8x1xf32>
    %cst_8 = arith.constant 0.000000e+00 : f32
    %14 = vector.broadcast %cst_8 : f32 to vector<8x1xf32>
    %15 = arith.maximumf %13, %14 : vector<8x1xf32>
    %16 = math.sqrt %15 : vector<8x1xf32>
    %cst_9 = arith.constant 9.99999997E-7 : f32
    %17 = vector.broadcast %cst_9 : f32 to vector<8x1xf32>
    %18 = arith.addf %16, %17 : vector<8x1xf32>
    %19 = tpu.reciprocal %18 : vector<8x1xf32> -> vector<8x1xf32>
    %20 = vector.broadcast %19 : vector<8x1xf32> to vector<8x128xf32>
    %21 = arith.mulf %8, %20 : vector<8x128xf32>
    %22 = vector.broadcast %1 : vector<1x128xf32> to vector<8x128xf32>
    %23 = arith.mulf %21, %22 : vector<8x128xf32>
    %24 = vector.broadcast %2 : vector<1x128xf32> to vector<8x128xf32>
    %25 = arith.addf %23, %24 : vector<8x128xf32>
    %c0_10 = arith.constant 0 : index
    %c0_11 = arith.constant 0 : index
    %26 = vector.load %arg5[%c0_10, %c0_11] : memref<128x384xf32, #tpu.memory_space<vmem>>, vector<128x384xf32>
    %cst_12 = arith.constant dense<0.000000e+00> : vector<8x384xf32>
    %27 = tpu.matmul %25, %26, %cst_12 {dimension_numbers = #tpu.dot_dimension_numbers<[1], [0], [0], [1], [0, 0, 1, 1], [], []>} : vector<8x128xf32>, vector<128x384xf32>, vector<8x384xf32> -> vector<8x384xf32>
    %c0_13 = arith.constant 0 : index
    %c0_14 = arith.constant 0 : index
    %28 = vector.load %arg6[%c0_13, %c0_14] : memref<1x384xf32, #tpu.memory_space<vmem>>, vector<1x384xf32>
    %29 = vector.broadcast %28 : vector<1x384xf32> to vector<8x384xf32>
    %30 = arith.addf %27, %29 : vector<8x384xf32>
    %c0_15 = arith.constant 0 : index
    %c0_16 = arith.constant 0 : index
    %31 = vector.load %arg7[%c0_15, %c0_16] : memref<8x384xf32, #tpu.memory_space<vmem>>, vector<8x384xf32>
    tpu.vector_store %arg7[%c0_15, %c0_16], %30 {strides = array<i32>} : memref<8x384xf32, #tpu.memory_space<vmem>>, vector<8x384xf32>,
    return
  }
  func.func @transform_0(%arg0: i32, %arg1: i32) -> (i32, i32) {
    %c0_i32 = arith.constant 0 : i32
    %c0_i32_0 = arith.constant 0 : i32
    return %arg0, %c0_i32 : i32, i32
  }
  func.func @transform_1(%arg0: i32, %arg1: i32) -> (i32, i32) {
    %c0_i32 = arith.constant 0 : i32
    %c0_i32_0 = arith.constant 0 : i32
    %c0_i32_1 = arith.constant 0 : i32
    return %c0_i32, %c0_i32_0 : i32, i32
  }
  func.func @transform_2(%arg0: i32, %arg1: i32) -> (i32, i32) {
    %c0_i32 = arith.constant 0 : i32
    %c0_i32_0 = arith.constant 0 : i32
    %c0_i32_1 = arith.constant 0 : i32
    return %c0_i32, %c0_i32_0 : i32, i32
  }
  func.func @transform_3(%arg0: i32, %arg1: i32) -> (i32, i32) {
    %c0_i32 = arith.constant 0 : i32
    %c0_i32_0 = arith.constant 0 : i32
    return %c0_i32, %arg1 : i32, i32
  }
  func.func @transform_4(%arg0: i32, %arg1: i32) -> (i32, i32) {
    %c0_i32 = arith.constant 0 : i32
    %c0_i32_0 = arith.constant 0 : i32
    return %c0_i32, %arg1 : i32, i32
  }
  func.func @transform_5(%arg0: i32, %arg1: i32) -> (i32, i32) {
    %c0_i32 = arith.constant 0 : i32
    return %arg0, %arg1 : i32, i32
  }
}

</mosaic_0001>

<bundles_post_ra>
// kernel: tpu_custom_call.1
= control target key start
LH: loop header
LB: loop body
LE: loop exit
PB: predicated region body
PF: predicated region fallthrough
CT: control target
= control target key end

     0   :  { %s1189_s0 = inlined_call_operand.hbm [shape: f32[16,128], index: 0, kind: input, shape index: {}]   ;;  %s1190_s1 = inlined_call_operand.hbm [shape: f32[1,128], index: 1, kind: input, shape index: {}]   ;;  %s1191_s2 = inlined_call_operand.hbm [shape: f32[1,128], index: 2, kind: input, shape index: {}]   ;;  %s1192_s3 = inlined_call_operand.hbm [shape: f32[128,384], index: 3, kind: input, shape index: {}]   ;;  %s1193_s4 = inlined_call_operand.vmem [shape: f32[1,384], index: 4, kind: input, shape index: {}]   ;;  %s1194_s5 = inlined_call_operand.hbm [shape: f32[16,384], index: 5, kind: output, shape index: {}]  }
   0x1   :  { %1195 = sst [smem:[#allocation15_spill]] %s1190_s1 }
   0x2   :  { %10 = vsyncpa [#allocation3], 0 }
   0x3   :  { %12 = vsyncpa [#allocation3 + $0x1], 0 }
   0x4   :  { %13 = vsyncpa [#allocation6], 0 }
   0x5   :  { %14 = vsyncpa [#allocation9], 0 }
   0x6   :  { %15 = vsyncpa [#allocation4], 0 }
   0x7   :  { %17 = vsyncpa [#allocation4 + $0x1], 0  ;;  %s1009_s18 = smov 0   ;;  %s1011_s19 = smov 0  }
   0x8   :  { %s1013_s20 = smov 0   ;;  %s1015_s21 = smov 0  }
   0x9   :  { %s1017_s22 = smov 0   ;;  %s1019_s23 = smov 0  }
   0xa LB: > { %s641_s24 = sadd.s32 4294967295, %s972_s23   ;;  %s642_s25 = sadd.s32 4294967294, %s972_s23   ;;  %s972_s23 = sphi %s1019_s23, %s23_s23   ;;  %s968_s22 = sphi %s1017_s22, %s1209_s22   ;;  %s964_s21 = sphi %s1015_s21, %s1208_s21   ;;  %s960_s20 = sphi %s1013_s20, %s1207_s20   ;;  %s956_s19 = sphi %s1011_s19, %s1206_s19   ;;  %s952_s18 = sphi %s1009_s18, %s1205_s18  }
   0xb   : > { %p55_p0 = scmp.ne.s32.totalorder %s956_s19, %s952_s18  ;;  %p1043_p1 = scmp.eq.s32.totalorder %s641_s24, 0 }
   0xc   : > { %p1047_p2 = scmp.eq.s32.totalorder %s641_s24, 1  ;;  %p181_p3 = scmp.eq.s32.totalorder %s642_s25, 1 }
   0xd   : > { %p1053_p4 = por %p1043_p1, %p55_p0  ;;  %p643_p5 = scmp.ge.s32.totalorder %s972_s23, 1 }
   0xe   : > { %p1058_p6 = por %p181_p3, %p55_p0  ;;  %p188_p7 = scmp.lt.s32.totalorder %s972_s23, 3 }
   0xf   : > { %s1200_s1 = sld [smem:[#allocation15_spill]]  ;;  %p648_p9 = scmp.ge.s32.totalorder %s972_s23, 2 }
  0x10   : > { %p1066_p8 = pnand %p643_p5, %p188_p7  ;;  %s974_s9 = smov [#allocation5]  }
  0x11   : > { %s202_s10 = sshll.u32 %s974_s9, 4  ;;  %s212_s13 = sshll.u32 %s1191_s2, 4  ;;  %s203_s10 = int_to_ptr.vmem [resolvable:$true] %s202_s10  ;;  %s213_s13 = int_to_ptr.hbm [resolvable:$true] %s212_s13 }
  0x12   : > { %p677_p10 = pneg %p1066_p8  ;;  %s226_s17 = sshll.u32 %s1192_s3, 4  ;;  %s227_s17 = int_to_ptr.hbm [resolvable:$true] %s226_s17 }
  0x13   : > { %s975_s24 = smov [#allocation7]   ;;  %s976_s30 = smov [#allocation8]  }
  0x14   : > { %p1078_p11 = pnand %p677_p10, %p1043_p1  ;;  %s214_s25 = sshll.u32 %s975_s24, 4  ;;  %s215_s25 = int_to_ptr.vmem [resolvable:$true] %s214_s25 }
  0x15   : > { %s200_s7 = sshll.u32 %s1200_s1, 4  ;;  %s228_s6 = sshll.u32 %s976_s30, 4  ;;  %s201_s7 = int_to_ptr.hbm [resolvable:$true] %s200_s7  ;;  %s229_s6 = int_to_ptr.vmem [resolvable:$true] %s228_s6 }
  0x16   : > { %680 = dma.hbm_to_vmem [thread:$0]  (!%p1078_p11), %s201_s7, 16, %s203_s10, [#allocation6]  }
  0x17   : > { %683 = dma.hbm_to_vmem [thread:$0]  (!%p1078_p11), %s213_s13, 16, %s215_s25, [#allocation6]  }
  0x18   : > { %s977_s9 = smov 384   ;;  %s978_s11 = smov 24  }
  0x19   : > { %686 = dma.hbm_to_vmem [thread:$0]  (!%p1078_p11), %s227_s17, 6144, %s229_s6, [#allocation9], %s977_s9, %s977_s9, %s978_s11  }
  0x1a   : > { %s42_s12 = sadd.s32 1, %s960_s20  ;;  %s35_s15 = sadd.s32 1, %s968_s22 }
  0x1b   : > { %p49_p12 = scmp.ne.s32.totalorder %s960_s20, %s956_s19  ;;  %p37_p13 = scmp.ge.s32.totalorder %s35_s15, 2 }
  0x1c   : > { %p50_p0 = scmp.eq.s32.totalorder %s972_s23, 0  ;;  %p698_p5 = scmp.lt.s32.totalorder %s972_s23, 2 }
  0x1d   : > { %p1098_p3 = por %p1047_p2, %p49_p12  ;;  %s1211_s15 = smov (%p37_p13, %s35_s15), 0 }
  0x1e   : > { %p1105_p7 = por %p50_p0, %p49_p12  ;;  %s250_s13 = sand.u32 1, %s960_s20  }
  0x1f   : > { %s39_s14 = ssub.s32 %s968_s22, %s1211_s15  ;;  %s649_s16 = sshll.u32 %s250_s13, 3 }
  0x20   : > { %p40_p10 = scmp.eq.s32.totalorder %s39_s14, 0  ;;  %s650_s17 = sshll.u32 %s968_s22, 3 }
  0x21   : > { %s258_s30 = scalar_lea.hbm %s1189_s0, %s650_s17  ;;  %s254_s6 = scalar_lea.vmem [#allocation2], %s649_s16 }
  0x22   : > { %s1114_s27 = scalar_select %p40_p10, %s960_s20, %s42_s12  }
  0x23   : > { %s262_s9 = sshll.u32 %s254_s6, 4  ;;  %s260_s11 = sshll.u32 %s258_s30, 4  ;;  %s263_s9 = int_to_ptr.vmem [resolvable:$true] %s262_s9  ;;  %s261_s11 = int_to_ptr.hbm [resolvable:$true] %s260_s11 }
  0x24   : > { %p688_p2 = pnand %p698_p5, %p1105_p7  ;;  %s251_s1 = scalar_lea.sflag [#allocation3], %s250_s13 }
  0x25   : > { %271 = sbr.rel (%p1066_p8) target bundleno = 474 (0x1da), region = 40  ;;  %s1126_s12 = sand.u32 (!%p1066_p8), 1, %s956_s19  }
  0x26   : > { %690 = dma.hbm_to_vmem [thread:$0]  (!%p688_p2), %s261_s11, 128, %s263_s9, %s251_s1  }
  0x27   : > { %s652_s14 = sshll.u32 (!%p1066_p8), %s1126_s12, 3  ;;  %s274_s16 = scalar_lea.sflag (!%p1066_p8), [#allocation3], %s1126_s12 }
  0x28   : > { %s277_s17 = scalar_lea.vmem (!%p1066_p8), [#allocation2], %s652_s14 }
  0x2a   : > { %935 = dma.done.wait (%p1053_p4), %s274_s16, 128  }
  0x2b   : > { %937 = vsyncadd (%p1053_p4), %s274_s16, 4294967168 }
  0x2c   : > { %939 = dma.done.wait (%p1043_p1), [#allocation6], 32  }
  0x2d   : > { %941 = vsyncadd (%p1043_p1), [#allocation6], 4294967264 }
  0x2e   : > { %943 = dma.done.wait (%p1043_p1), [#allocation9], 6144  }
  0x2f   : > { %945 = vsyncadd (%p1043_p1), [#allocation9], 4294961152  ;;  %v331_v0 = vld [vmem:[%s277_s17] sm:$0xff]  ;;  %v423_v10 = vld [vmem:[#allocation8 + $0x160] sm:$0xff]  ;;  %s659_s28 = smul.u32 24, %s1126_s12  ;;  %s902_s17 = scalar_lea.hbm %s1194_s5, 48 }
  0x30   : > { %334 = vadd.xlane.f32.xlu0 %v331_v0  ;;  %v424_v5 = vld [vmem:[#allocation8 + $0x168] sm:$0xff]  ;;  %v425_v6 = vld [vmem:[#allocation8 + $0x170] sm:$0xff]  ;;  %v426_v7 = vld [vmem:[#allocation8 + $0x178] sm:$0xff]  ;;  %s660_s8 = smul.u32 24, %s964_s21  ;;  %s499_s21 = scalar_lea.sflag [#allocation4], %s1126_s12 }
  0x31   : > { %435 = vmatpush.msra.mxu0 %v424_v5  ;;  %455 = vmatpush.msra.mxu1 %v425_v6  ;;  %v421_v8 = vld [vmem:[#allocation8 + $0x150] sm:$0xff]  ;;  %v422_v9 = vld [vmem:[#allocation8 + $0x158] sm:$0xff]  ;;  %v419_v12 = vld [vmem:[#allocation8 + $0x140] sm:$0xff]  ;;  %s323_s25 = scalar_lea.vmem [#allocation10], %s659_s28 }
  0x32   : > { %475 = vmatpush.msra.mxu2 %v426_v7  ;;  %v418_v11 = vld [vmem:[#allocation8 + $0x138] sm:$0xff]  ;;  %v420_v13 = vld [vmem:[#allocation8 + $0x148] sm:$0xff]  ;;  %v415_v14 = vld [vmem:[#allocation8 + $0x120] sm:$0xff]  ;;  %s512_s24 = scalar_lea.hbm %s1194_s5, %s660_s8  ;;  %s514_s30 = sshll.u32 %s323_s25, 4  ;;  %s515_s30 = int_to_ptr.vmem [resolvable:$true] %s514_s30 }
  0x33   : > { %436 = vmatpush.msra.mxu0 %v421_v8  ;;  %456 = vmatpush.msra.mxu1 %v422_v9  ;;  %v416_v15 = vld [vmem:[#allocation8 + $0x128] sm:$0xff]  ;;  %v417_v16 = vld [vmem:[#allocation8 + $0x130] sm:$0xff]  ;;  %v414_v19 = vld [vmem:[#allocation8 + $0x118] sm:$0xff]  ;;  %s516_s6 = sshll.u32 %s512_s24, 4  ;;  %s517_s6 = int_to_ptr.hbm [resolvable:$true] %s516_s6 }
  0x34   : > { %476 = vmatpush.msra.mxu2 %v423_v10  ;;  %v412_v17 = vld [vmem:[#allocation8 + $0x108] sm:$0xff]  ;;  %v413_v18 = vld [vmem:[#allocation8 + $0x110] sm:$0xff]  ;;  %v410_v21 = vld [vmem:[#allocation8 + $0xf8] sm:$0xff]  ;;  %s896_s9 = sshra.s32 %s517_s6, 4  ;;  %s897_s9 = int_to_ptr.hbm [resolvable:$true] %s896_s9 }
  0x35   : > { %437 = vmatpush.msra.mxu0 %v418_v11  ;;  %457 = vmatpush.msra.mxu1 %v419_v12  ;;  %v409_v20 = vld [vmem:[#allocation8 + $0xf0] sm:$0xff]  ;;  %v411_v22 = vld [vmem:[#allocation8 + $0x100] sm:$0xff]  ;;  %v406_v23 = vld [vmem:[#allocation8 + $0xd8] sm:$0xff]  ;;  %s898_s11 = scalar_lea.hbm %s897_s9, 24  ;;  %p903_p11 = scmp.lt.s32.totalorder %s897_s9, %s1194_s5 }
  0x36   : > { %477 = vmatpush.msra.mxu2 %v420_v13  ;;  %v407_v24 = vld [vmem:[#allocation8 + $0xe0] sm:$0xff]  ;;  %v408_v25 = vld [vmem:[#allocation8 + $0xe8] sm:$0xff]  ;;  %v405_v29 = vld [vmem:[#allocation8 + $0xd0] sm:$0xff]  ;;  %p899_p1 = scmp.ne.s32.totalorder %s897_s9, %s898_s11  ;;  %p904_p12 = scmp.lt.s32.totalorder %s902_s17, %s898_s11 }
  0x37   : > { %438 = vmatpush.msra.mxu0 %v415_v14  ;;  %458 = vmatpush.msra.mxu1 %v416_v15  ;;  %v403_v26 = vld [vmem:[#allocation8 + $0xc0] sm:$0xff]  ;;  %v404_v27 = vld [vmem:[#allocation8 + $0xc8] sm:$0xff]  ;;  %v401_v32 = vld [vmem:[#allocation8 + $0xb0] sm:$0xff] }
  0x38   : > { %478 = vmatpush.msra.mxu2 %v417_v16  ;;  %v400_v31 = vld [vmem:[#allocation8 + $0xa8] sm:$0xff]  ;;  %v402_v33 = vld [vmem:[#allocation8 + $0xb8] sm:$0xff]  ;;  %v397_v35 = vld [vmem:[#allocation8 + $0x90] sm:$0xff]  ;;  %p900_p4 = pnand %p899_p1, %p1098_p3  ;;  %p905_p13 = por %p904_p12, %p903_p11 }
  0x39   : > { %439 = vmatpush.msra.mxu0 %v412_v17  ;;  %459 = vmatpush.msra.mxu1 %v413_v18  ;;  %v398_v36 = vld [vmem:[#allocation8 + $0x98] sm:$0xff]  ;;  %v399_v37 = vld [vmem:[#allocation8 + $0xa0] sm:$0xff]  ;;  %v396_v40 = vld [vmem:[#allocation8 + $0x88] sm:$0xff] }
  0x3a   : > { %479 = vmatpush.msra.mxu2 %v414_v19  ;;  %v394_v38 = vld [vmem:[#allocation8 + $0x78] sm:$0xff]  ;;  %v395_v39 = vld [vmem:[#allocation8 + $0x80] sm:$0xff]  ;;  %v392_v42 = vld [vmem:[#allocation8 + $0x68] sm:$0xff]  ;;  %p901_p8 = pneg %p900_p4 }
  0x3b   : > { %440 = vmatpush.msra.mxu0 %v409_v20  ;;  %460 = vmatpush.msra.mxu1 %v410_v21  ;;  %v391_v41 = vld [vmem:[#allocation8 + $0x60] sm:$0xff]  ;;  %v393_v43 = vld [vmem:[#allocation8 + $0x70] sm:$0xff]  ;;  %v388_v44 = vld [vmem:[#allocation8 + $0x48] sm:$0xff] }
  0x3c   : > { %480 = vmatpush.msra.mxu2 %v411_v22  ;;  %v389_v45 = vld [vmem:[#allocation8 + $0x50] sm:$0xff]  ;;  %v390_v46 = vld [vmem:[#allocation8 + $0x58] sm:$0xff]  ;;  %v387_v51 = vld [vmem:[#allocation8 + $0x40] sm:$0xff]  ;;  %p906_p0 = pnand %p905_p13, %p901_p8 }
  0x3d   : > { %441 = vmatpush.msra.mxu0 %v406_v23  ;;  %461 = vmatpush.msra.mxu1 %v407_v24  ;;  %v385_v48 = vld [vmem:[#allocation8 + $0x30] sm:$0xff]  ;;  %v386_v49 = vld [vmem:[#allocation8 + $0x38] sm:$0xff]  ;;  %v383_v53 = vld [vmem:[#allocation8 + $0x20] sm:$0xff] }
  0x3e   : > { %481 = vmatpush.msra.mxu2 %v408_v25  ;;  %v382_v52 = vld [vmem:[#allocation8 + $0x18] sm:$0xff]  ;;  %v384_v55 = vld [vmem:[#allocation8 + $0x28] sm:$0xff]  ;;  %v379_v56 = vld [vmem:[#allocation8] sm:$0xff] }
  0x3f   : > { %442 = vmatpush.msra.mxu0 %v403_v26  ;;  %462 = vmatpush.msra.mxu1 %v404_v27  ;;  %v380_v57 = vld [vmem:[#allocation8 + $0x8] sm:$0xff]  ;;  %v381_v59 = vld [vmem:[#allocation8 + $0x10] sm:$0xff]  ;;  %v756_v13 = vld [vmem:[#allocation5] ss:$0 sm:$0xff] }
  0x40   : > { %482 = vmatpush.msra.mxu2 %v405_v29  ;;  %v757_v16 = vld [vmem:[#allocation7] ss:$0 sm:$0xff]  ;;  %v427_v19 = vld [vmem:[%s1193_s4] sm:$0x7] }
  0x41   : > { %443 = vmatpush.msra.mxu0 %v400_v31  ;;  %463 = vmatpush.msra.mxu1 %v401_v32  ;;  %v429_v20 = vperm.slane %v427_v19, 0  ;;  %v430_v21 = vperm.slane %v427_v19, 1 }
  0x42   : > { %483 = vmatpush.msra.mxu2 %v402_v33 }
  0x43   : > { %444 = vmatpush.msra.mxu0 %v397_v35  ;;  %464 = vmatpush.msra.mxu1 %v398_v36 }
  0x44   : > { %484 = vmatpush.msra.mxu2 %v399_v37 }
  0x45   : > { %445 = vmatpush.msra.mxu0 %v394_v38  ;;  %465 = vmatpush.msra.mxu1 %v395_v39 }
  0x46   : > { %485 = vmatpush.msra.mxu2 %v396_v40 }
  0x47   : > { %446 = vmatpush.msra.mxu0 %v391_v41  ;;  %466 = vmatpush.msra.mxu1 %v392_v42 }
  0x48   : > { %486 = vmatpush.msra.mxu2 %v393_v43 }
  0x49   : > { %447 = vmatpush.msra.mxu0 %v388_v44  ;;  %467 = vmatpush.msra.mxu1 %v389_v45 }
  0x4a   : > { %487 = vmatpush.msra.mxu2 %v390_v46 }
  0x4b   : > { %448 = vmatpush.msra.mxu0 %v385_v48  ;;  %468 = vmatpush.msra.mxu1 %v386_v49 }
  0x4c   : > { %488 = vmatpush.msra.mxu2 %v387_v51 }
  0x4d   : > { %449 = vmatpush.msra.mxu0 %v382_v52  ;;  %469 = vmatpush.msra.mxu1 %v383_v53 }
  0x4e   : > { %489 = vmatpush.msra.mxu2 %v384_v55 }
  0x4f   : > { %450 = vmatpush.msra.mxu0 %v379_v56  ;;  %470 = vmatpush.msra.mxu1 %v380_v57 }
  0x50   : > { %490 = vmatpush.msra.mxu2 %v381_v59 }
  0xa3   : > { %v335_v1 = vpop.xlane.xlu0 %334 }
  0xa4   : > { %v336_v2 = vmul.f32 0.0078125, %v335_v1 }
  0xa6   : > { %v1142_v3 = vsub.f32 %v331_v0, %v336_v2 }
  0xa8   : > { %v338_v4 = vmul.f32 %v1142_v3, %v1142_v3 }
  0xaa   : > { %339 = vadd.xlane.f32.xlu0 %v338_v4 }
 0x11d   : > { %v340_v28 = vpop.xlane.xlu0 %339 }
 0x11e   : > { %v341_v30 = vmul.f32 0.007874016, %v340_v28 }
 0x120   : > { %v342_v34 = vmax.f32 %v341_v30, 0.0 }
 0x122   : > { %758 = vrsqrt.f32 %v342_v34  ;;  %vm350_vm0 = vcmp.eq.f32.partialorder %v342_v34, inf  ;;  %v353_v63 = vand.u32 2147483648, %v342_v34  ;;  %vm352_vm1 = vcmp.eq.f32.partialorder %v342_v34, 0.0 }
 0x128   : > { %v759_v47 = vpop.eup %758 }
 0x129   : > { %v344_v50 = vmul.f32 %v759_v47, %v342_v34 }
 0x12b   : > { %v345_v54 = vmul.f32 %v759_v47, %v344_v50 }
 0x12d   : > { %v346_v58 = vmul.f32 0.5, %v345_v54 }
 0x12f   : > { %v347_v60 = vsub.f32 1.5, %v346_v58 }
 0x131   : > { %v348_v61 = vmul.f32 %v759_v47, %v347_v60 }
 0x133   : > { %v349_v62 = vmul.f32 %v348_v61, %v342_v34 }
 0x135   : > { %v351_v0 = vsel %vm350_vm0, %v342_v34, %v349_v62 }
 0x136   : > { %v354_v1 = vsel %vm352_vm1, %v353_v63, %v351_v0 }
 0x137   : > { %v355_v2 = vadd.f32 1e-06, %v354_v1 }
 0x139   : > { %760 = vrcp.f32 %v355_v2  ;;  %v367_v7 = vand.u32 2147483648, %v355_v2  ;;  %v365_v9 = vand.u32 2147483647, %v355_v2  ;;  %vm361_vm3 = vweird.f32 %v355_v2 }
 0x13b   : > { %v368_v11 = vor.u32 1.1754944e-38, %v367_v7  ;;  %vm366_vm5 = vcmp.eq.f32.partialorder %v365_v9, 8.507059e+37 }
 0x13f   : > { %v761_v4 = vpop.eup %760 }
 0x140   : > { %v357_v5 = vmul.f32 %v761_v4, %v355_v2  ;;  %vm362_vm2 = vweird.f32 %v761_v4 }
 0x141   : > { %vm363_vm4 = vmor %vm361_vm3, %vm362_vm2 }
 0x142   : > { %v358_v6 = vsub.f32 1.0, %v357_v5 }
 0x144   : > { %v359_v8 = vmul.f32 %v761_v4, %v358_v6 }
 0x146   : > { %v360_v10 = vadd.f32 %v761_v4, %v359_v8 }
 0x148   : > { %v364_v12 = vsel %vm363_vm4, %v761_v4, %v360_v10 }
 0x149   : > { %v369_v14 = vsel %vm366_vm5, %v368_v11, %v364_v12 }
 0x14a   : > { %v370_v15 = vmul.f32 %v369_v14, %v1142_v3  ;;  %v431_v3 = vperm.slane %v427_v19, 2 }
 0x14c   : > { %v374_v17 = vmul.f32 %v756_v13, %v370_v15 }
 0x14e   : > { %v378_v18 = vadd.f32 %v757_v16, %v374_v17 }
 0x150   : > { %451 = vmatmul.f32.vlgmr.msra.gmra.mxu0 %v378_v18  ;;  %471 = vmatmul.f32.vlgmr.msra.gmra.mxu1 %v378_v18 }
 0x151   : > { %491 = vmatmul.f32.vlgmr.msra.gmra.mxu2 %v378_v18 }
 0x1cd   : > { %v452_v22 = vpop.f32.mrf.mxu0  ;;  %v472_v23 = vpop.f32.mrf.mxu1 }
 0x1ce   : > { %v453_v24 = vadd.f32 %v452_v22, %v429_v20  ;;  %v473_v25 = vadd.f32 %v472_v23, %v430_v21 }
 0x1d0   : > { %495 = vst [vmem:[%s323_s25] sm:$0xff] %v453_v24 }
 0x1d1   : > { %496 = vst [vmem:[%s323_s25 + $0x8] sm:$0xff] %v473_v25 }
 0x1d4   : > { %v492_v26 = vpop.f32.mrf.mxu2 }
 0x1d5   : > { %v493_v27 = vadd.f32 %v492_v26, %v431_v3 }
 0x1d7   : > { %497 = vst [vmem:[%s323_s25 + $0x10] sm:$0xff] %v493_v27 }
 0x1d8   : > { %909 = shalt.err (!%p906_p0)
}
 0x1d9   : > { %675 = dma.vmem_to_hbm [thread:$0]  (%p1098_p3), %s515_s30, 384, %s517_s6, %s499_s21  }
 0x1da PF: > { %s528_s12 = sand.u32 1, %s952_s18   ;;  %p692_p5 = pnand %p648_p9, %p1058_p6 }
 0x1db   : > { %s529_s28 = scalar_lea.sflag [#allocation4], %s528_s12 }
 0x1dc   : > { %p693_p7 = pneg %p692_p5 }
 0x1de   : > { %947 = dma.done.wait (%p693_p7), %s529_s28, 384  }
 0x1df   : > { %949 = vsyncadd (%p693_p7), %s529_s28, 4294966912  ;;  %s23_s23 = sadd.s32 1, %s972_s23   ;;  %s1205_s18 = smov %s956_s19 }
 0x1e0   : > { %p20_p10 = scmp.ge.s32.totalorder %s23_s23, 4   ;;  %s1206_s19 = smov %s960_s20 }
 0x1e1   : > { %s1207_s20 = smov %s1114_s27  ;;  %s1208_s21 = smov %s968_s22 }
 0x1e2   : > { %s1209_s22 = smov %s1211_s15  ;;  %22 = sbr.rel (!%p20_p10) target bundleno = 10 (0xa), region = 101 }
 0x1e7   :  { %535 = vsyncpa [#allocation3], 1 }
 0x1e8   :  { %537 = vsyncpa [#allocation3 + $0x1], 1 }
 0x1e9   :  { %538 = vsyncpa [#allocation6], 1 }
 0x1ea   :  { %539 = vsyncpa [#allocation9], 1 }
 0x1eb   :  { %540 = vsyncpa [#allocation4], 1 }
 0x1ec   :  { %542 = vsyncpa [#allocation4 + $0x1], 1 }

</bundles_post_ra>
